<compile_context>
chip_gen: v7x
topology: tpu7x:2x2x1
jax: 0.10.0
libtpu: 0.0.40
codegen_flags: <defaults>
</compile_context>

<pallas_src>
import jax
import jax.numpy as jnp
from jax.experimental import pallas as pl
from jax.experimental.pallas import tpu as pltpu

LANE = 128


def _pad_to(n, m=LANE):
    return ((n + m - 1) // m) * m


def _fused_decoder_kernel(
    tok_ref,    # SMEM (T,)  int32    scalar-prefetched token ids (teacher forcing)
    h0_ref,     # VMEM (1, H)         initial hidden state
    emb_ref,    # VMEM (V, 1, H)      embedding table (resident for whole decode)
    wih_ref,    # VMEM (H, 3*Gp)      GRU input weights, gates [r|z|n] on 128-lane bounds
    bih_ref,    # VMEM (1, 3*Gp)
    whh_ref,    # VMEM (H, 3*Gp)      GRU hidden weights, gates [r|z|n]
    bhh_ref,    # VMEM (1, 3*Gp)
    wo_ref,     # VMEM (H, Op)        output projection (pre-transposed)
    bo_ref,     # VMEM (1, Op)        bias; padded lanes hold -1e30 (f32)
    logp_ref,   # VMEM out (1, 1, Op) this step's log-softmax row
    hout_ref,   # VMEM out (1, H)     final hidden state (written on last step)
    h_scratch,  # VMEM scratch (1, H) hidden state carried across grid steps
):
    f32 = jnp.float32
    t = pl.program_id(0)
    H = h_scratch.shape[1]
    Gp = wih_ref.shape[1] // 3          # 128-lane gate stride

    @pl.when(t == 0)
    def _():
        h_scratch[...] = h0_ref[...]

    # output = relu(embedding(input)) — dynamic row read from the resident table.
    tok = tok_ref[t]
    emb = jnp.maximum(emb_ref[tok], 0.0)                     # (1, H)
    hid = h_scratch[...]                                     # (1, H)

    # GRU cell: one packed MXU matmul per side (gates r|z|n along the lane axis).
    gi = jnp.dot(emb, wih_ref[...], preferred_element_type=f32) + bih_ref[...]
    gh = jnp.dot(hid, whh_ref[...], preferred_element_type=f32) + bhh_ref[...]

    # PyTorch gate order (r, z, n); each slice starts on a vreg (128-lane) boundary.
    r = jax.nn.sigmoid(gi[:, 0:H] + gh[:, 0:H])
    z = jax.nn.sigmoid(gi[:, Gp:Gp + H] + gh[:, Gp:Gp + H])
    n = jnp.tanh(gi[:, 2 * Gp:2 * Gp + H] + r * gh[:, 2 * Gp:2 * Gp + H])
    h_new = (1.0 - z) * n + z * hid
    h_scratch[...] = h_new

    # output = log_softmax(self.out(gru_output)); -1e30 padded bias lanes
    # underflow to exactly 0 in the softmax sum.
    logits = jnp.dot(h_new, wo_ref[...], preferred_element_type=f32) + bo_ref[...]
    m = jnp.max(logits, axis=1, keepdims=True)
    lse = m + jnp.log(jnp.sum(jnp.exp(logits - m), axis=1, keepdims=True))
    logp_ref[...] = (logits - lse).reshape(logp_ref.shape)

    @pl.when(t == pl.num_programs(0) - 1)
    def _():
        hout_ref[...] = h_new


def pack_params(params):
    """Repack PyTorch-layout params into the kernel layout.

    Gate weights (3H, H) -> (H, 3*Gp): gates [r|z|n] each start on a 128-lane
    boundary (Gp = pad(H, 128)); the contracting dim H stays UNPADDED (f32 only
    needs the sublane dim to be a multiple of 8).
    """
    emb = params["emb"]                               # (V, H)
    w_ih, b_ih = params["w_ih"], params["b_ih"]       # (3H, H), (3H,)
    w_hh, b_hh = params["w_hh"], params["b_hh"]       # (3H, H), (3H,)
    w_out, b_out = params["w_out"], params["b_out"]   # (OUT, H), (OUT,)

    V, H = emb.shape
    OUT = w_out.shape[0]
    Gp, Op = _pad_to(H), _pad_to(OUT)

    emb_p = emb.astype(jnp.float32).reshape(V, 1, H)

    def pack_gates(w, b):  # (3H, H), (3H,) -> (H, 3*Gp), (1, 3*Gp)
        wp = jnp.zeros((H, 3 * Gp), jnp.float32)
        bp = jnp.zeros((1, 3 * Gp), jnp.float32)
        for g in range(3):
            wp = wp.at[:, g * Gp:g * Gp + H].set(w[g * H:(g + 1) * H, :].T)
            bp = bp.at[0, g * Gp:g * Gp + H].set(b[g * H:(g + 1) * H])
        return wp, bp

    wih_p, bih_p = pack_gates(w_ih, b_ih)
    whh_p, bhh_p = pack_gates(w_hh, b_hh)

    wo_p = jnp.zeros((H, Op), jnp.float32).at[:, :OUT].set(w_out.T)
    bo_p = jnp.full((1, Op), -1e30, jnp.float32).at[0, :OUT].set(b_out)

    return dict(emb=emb_p, wih=wih_p, bih=bih_p, whh=whh_p, bhh=bhh_p,
                wo=wo_p, bo=bo_p, H=H, OUT=OUT, V=V)


def decoder_decode(tok_ids, hidden, packed):
    """Teacher-forced decode of T steps in ONE fused pallas_call.

    tok_ids: (T,) int ids; hidden: (1, 1, H).
    Returns (log_probs (T, OUT), final hidden (1, 1, H)).
    """
    H, OUT, V = packed["H"], packed["OUT"], packed["V"]
    Gp3 = packed["wih"].shape[1]
    Op = packed["wo"].shape[1]
    T = int(tok_ids.shape[0])

    tok_arr = jnp.asarray(tok_ids, jnp.int32).reshape(T)
    h0 = jnp.asarray(hidden, jnp.float32).reshape(1, H)

    const2 = lambda t, tok: (0, 0)        # resident blocks: DMA'd once, stay in VMEM
    const3 = lambda t, tok: (0, 0, 0)

    grid_spec = pltpu.PrefetchScalarGridSpec(
        num_scalar_prefetch=1,            # tok_arr lands in SMEM before the grid runs
        grid=(T,),
        in_specs=[
            pl.BlockSpec((1, H), const2),          # h0
            pl.BlockSpec((V, 1, H), const3),       # embedding table (resident)
            pl.BlockSpec((H, Gp3), const2),        # w_ih packed
            pl.BlockSpec((1, Gp3), const2),        # b_ih
            pl.BlockSpec((H, Gp3), const2),        # w_hh packed
            pl.BlockSpec((1, Gp3), const2),        # b_hh
            pl.BlockSpec((H, Op), const2),         # w_out
            pl.BlockSpec((1, Op), const2),         # b_out
        ],
        out_specs=(
            pl.BlockSpec((1, 1, Op), lambda t, tok: (t, 0, 0)),  # per-step log-probs
            pl.BlockSpec((1, H), const2),                        # final hidden
        ),
        scratch_shapes=[pltpu.VMEM((1, H), jnp.float32)],        # carried hidden state
    )

    logp_p, h_final = pl.pallas_call(
        _fused_decoder_kernel,
        grid_spec=grid_spec,
        out_shape=(
            jax.ShapeDtypeStruct((T, 1, Op), jnp.float32),
            jax.ShapeDtypeStruct((1, H), jnp.float32),
        ),
        compiler_params=pltpu.CompilerParams(
            dimension_semantics=("arbitrary",)),   # sequential carry across steps
    )(tok_arr, h0, packed["emb"], packed["wih"], packed["bih"],
      packed["whh"], packed["bhh"], packed["wo"], packed["bo"])

    return logp_p.reshape(T, Op)[:, :OUT], h_final.reshape(1, 1, H)


def decoder_forward(token, hidden, packed):
    """Single DecoderRNN.forward step (API parity with the PyTorch module)."""
    tok = jnp.asarray(token, jnp.int32).reshape(1)
    logp, h_new = decoder_decode(tok, hidden, packed)
    return logp, h_new


# ----------------------------- pure-JAX reference -----------------------------

def _reference_forward(token, hidden, params):
    """Mirrors the PyTorch DecoderRNN.forward (one step)."""
    H = params["w_hh"].shape[1]
    tok = jnp.asarray(token, jnp.int32).reshape(())
    x = jax.nn.relu(params["emb"][tok]).reshape(1, H)
    h = hidden.reshape(1, H)
    gi = x @ params["w_ih"].T + params["b_ih"]
    gh = h @ params["w_hh"].T + params["b_hh"]
    i_r, i_z, i_n = jnp.split(gi, 3, axis=1)
    h_r, h_z, h_n = jnp.split(gh, 3, axis=1)
    r = jax.nn.sigmoid(i_r + h_r)
    z = jax.nn.sigmoid(i_z + h_z)
    n = jnp.tanh(i_n + r * h_n)
    h_new = (1.0 - z) * n + z * h
    logits = h_new @ params["w_out"].T + params["b_out"]
    return jax.nn.log_softmax(logits, axis=1), h_new.reshape(1, 1, H)


def _reference_decode(tok_ids, hidden, params):
    outs, h = [], hidden
    for t in range(int(tok_ids.shape[0])):
        o, h = _reference_forward(tok_ids[t], h, params)
        outs.append(o)
    return jnp.concatenate(outs, axis=0), h


def make_params(key, hidden_size, output_size):
    """PyTorch-layout parameters (nn.Embedding / nn.GRU / nn.Linear)."""
    H, OUT = hidden_size, output_size
    ks = jax.random.split(key, 7)
    s = 1.0 / jnp.sqrt(jnp.float32(H))
    u = lambda k, shape: jax.random.uniform(k, shape, jnp.float32, -s, s)
    return {
        "emb": jax.random.normal(ks[0], (OUT, H), jnp.float32),
        "w_ih": u(ks[1], (3 * H, H)),
        "b_ih": u(ks[2], (3 * H,)),
        "w_hh": u(ks[3], (3 * H, H)),
        "b_hh": u(ks[4], (3 * H,)),
        "w_out": u(ks[5], (OUT, H)),
        "b_out": u(ks[6], (OUT,)),
    }


if __name__ == "__main__":
    HIDDEN = 64     # hidden_size from the module spec
    OUTPUT = 24     # small output vocabulary
    T = 8           # decode steps fused into one pallas_call

    key = jax.random.PRNGKey(0)
    params = make_params(key, HIDDEN, OUTPUT)
    packed = pack_params(params)

    tok_ids = jax.random.randint(jax.random.PRNGKey(1), (T,), 0, OUTPUT,
                                 dtype=jnp.int32)
    hidden0 = jnp.zeros((1, 1, HIDDEN), jnp.float32)     # initHidden()

    # Fused T-step teacher-forced decode (single kernel launch).
    logp, h_final = decoder_decode(tok_ids, hidden0, packed)
    jax.block_until_ready((logp, h_final))

    ref_logp, ref_h = _reference_decode(tok_ids, hidden0, params)
    assert logp.shape == (T, OUTPUT) and h_final.shape == (1, 1, HIDDEN)
    assert jnp.allclose(logp, ref_logp, atol=1e-4, rtol=1e-4)
    assert jnp.allclose(h_final, ref_h, atol=1e-4, rtol=1e-4)

    # Single-step forward, same call contract as the PyTorch module.
    out1, h1 = decoder_forward(int(tok_ids[0]), hidden0, packed)
    jax.block_until_ready((out1, h1))
    ref_out1, ref_h1 = _reference_forward(tok_ids[0], hidden0, params)
    assert out1.shape == (1, OUTPUT) and h1.shape == (1, 1, HIDDEN)
    assert jnp.allclose(out1, ref_out1, atol=1e-4, rtol=1e-4)
    assert jnp.allclose(h1, ref_h1, atol=1e-4, rtol=1e-4)

    print("KERNEL_OK")
</pallas_src>

<mosaic_0001>
module attributes {stable_mosaic.version = 11 : i64} {
  func.func @_fused_decoder_kernel(%arg0: i32, %arg1: memref<8xi32, #tpu.memory_space<smem>>, %arg2: memref<1x64xf32, #tpu.memory_space<vmem>>, %arg3: memref<24x1x64xf32, #tpu.memory_space<vmem>>, %arg4: memref<64x384xf32, #tpu.memory_space<vmem>>, %arg5: memref<1x384xf32, #tpu.memory_space<vmem>>, %arg6: memref<64x384xf32, #tpu.memory_space<vmem>>, %arg7: memref<1x384xf32, #tpu.memory_space<vmem>>, %arg8: memref<64x128xf32, #tpu.memory_space<vmem>>, %arg9: memref<1x128xf32, #tpu.memory_space<vmem>>, %arg10: memref<1x1x128xf32, #tpu.memory_space<vmem>>, %arg11: memref<1x64xf32, #tpu.memory_space<vmem>>, %arg12: memref<1x64xf32, #tpu.memory_space<vmem>>) attributes {dimension_semantics = [#tpu.dimension_semantics<arbitrary>], iteration_bounds = array<i64: 8>, scalar_prefetch = 1 : i64, scratch_operands = 1 : i64, tpu.core_type = #tpu.core_type<tc>, window_params = [{pipeline_mode = #tpu.pipeline_mode<synchronous>, transform_indices = @transform_0, window_bounds = array<i64: 1, 64>}, {pipeline_mode = #tpu.pipeline_mode<synchronous>, transform_indices = @transform_1, window_bounds = array<i64: 24, 1, 64>}, {pipeline_mode = #tpu.pipeline_mode<synchronous>, transform_indices = @transform_2, window_bounds = array<i64: 64, 384>}, {pipeline_mode = #tpu.pipeline_mode<synchronous>, transform_indices = @transform_3, window_bounds = array<i64: 1, 384>}, {pipeline_mode = #tpu.pipeline_mode<synchronous>, transform_indices = @transform_4, window_bounds = array<i64: 64, 384>}, {pipeline_mode = #tpu.pipeline_mode<synchronous>, transform_indices = @transform_5, window_bounds = array<i64: 1, 384>}, {pipeline_mode = #tpu.pipeline_mode<synchronous>, transform_indices = @transform_6, window_bounds = array<i64: 64, 128>}, {pipeline_mode = #tpu.pipeline_mode<synchronous>, transform_indices = @transform_7, window_bounds = array<i64: 1, 128>}, {transform_indices = @transform_8, window_bounds = array<i64: 1, 1, 128>}, {pipeline_mode = #tpu.pipeline_mode<synchronous>, transform_indices = @transform_9, window_bounds = array<i64: 1, 64>}]} {
    %c0_i32 = arith.constant 0 : i32
    %0 = arith.cmpi eq, %arg0, %c0_i32 : i32
    %1 = arith.extui %0 : i1 to i32
    %c0_i32_0 = arith.constant 0 : i32
    %2 = arith.cmpi ne, %1, %c0_i32_0 : i32
    scf.if %2 {
      %c0_30 = arith.constant 0 : index
      %c0_31 = arith.constant 0 : index
      %66 = vector.load %arg2[%c0_30, %c0_31] : memref<1x64xf32, #tpu.memory_space<vmem>>, vector<1x64xf32>
      %c0_32 = arith.constant 0 : index
      %c0_33 = arith.constant 0 : index
      %67 = vector.load %arg12[%c0_32, %c0_33] : memref<1x64xf32, #tpu.memory_space<vmem>>, vector<1x64xf32>
      tpu.vector_store %arg12[%c0_32, %c0_33], %66 {strides = array<i32>} : memref<1x64xf32, #tpu.memory_space<vmem>>, vector<1x64xf32>,
    } else {
    }
    %3 = arith.index_cast %arg0 : i32 to index
    %4 = memref.load %arg1[%3] : memref<8xi32, #tpu.memory_space<smem>>
    %5 = arith.index_cast %4 : i32 to index
    %c0 = arith.constant 0 : index
    %c0_1 = arith.constant 0 : index
    %6 = vector.load %arg3[%5, %c0, %c0_1] : memref<24x1x64xf32, #tpu.memory_space<vmem>>, vector<1x1x64xf32>
    %7 = vector.shape_cast %6 : vector<1x1x64xf32> to vector<1x64xf32>
    %cst = arith.constant 0.000000e+00 : f32
    %8 = vector.broadcast %cst : f32 to vector<1x64xf32>
    %9 = arith.maximumf %7, %8 : vector<1x64xf32>
    %c0_2 = arith.constant 0 : index
    %c0_3 = arith.constant 0 : index
    %10 = vector.load %arg12[%c0_2, %c0_3] : memref<1x64xf32, #tpu.memory_space<vmem>>, vector<1x64xf32>
    %c0_4 = arith.constant 0 : index
    %c0_5 = arith.constant 0 : index
    %11 = vector.load %arg4[%c0_4, %c0_5] : memref<64x384xf32, #tpu.memory_space<vmem>>, vector<64x384xf32>
    %cst_6 = arith.constant dense<0.000000e+00> : vector<1x384xf32>
    %12 = tpu.matmul %9, %11, %cst_6 {dimension_numbers = #tpu.dot_dimension_numbers<[1], [0], [0], [1], [0, 0, 1, 1], [], []>} : vector<1x64xf32>, vector<64x384xf32>, vector<1x384xf32> -> vector<1x384xf32>
    %c0_7 = arith.constant 0 : index
    %c0_8 = arith.constant 0 : index
    %13 = vector.load %arg5[%c0_7, %c0_8] : memref<1x384xf32, #tpu.memory_space<vmem>>, vector<1x384xf32>
    %14 = arith.addf %12, %13 : vector<1x384xf32>
    %c0_9 = arith.constant 0 : index
    %c0_10 = arith.constant 0 : index
    %15 = vector.load %arg6[%c0_9, %c0_10] : memref<64x384xf32, #tpu.memory_space<vmem>>, vector<64x384xf32>
    %cst_11 = arith.constant dense<0.000000e+00> : vector<1x384xf32>
    %16 = tpu.matmul %10, %15, %cst_11 {dimension_numbers = #tpu.dot_dimension_numbers<[1], [0], [0], [1], [0, 0, 1, 1], [], []>} : vector<1x64xf32>, vector<64x384xf32>, vector<1x384xf32> -> vector<1x384xf32>
    %c0_12 = arith.constant 0 : index
    %c0_13 = arith.constant 0 : index
    %17 = vector.load %arg7[%c0_12, %c0_13] : memref<1x384xf32, #tpu.memory_space<vmem>>, vector<1x384xf32>
    %18 = arith.addf %16, %17 : vector<1x384xf32>
    %19 = vector.extract_strided_slice %14 {offsets = [0, 0], sizes = [1, 64], strides = [1, 1]} : vector<1x384xf32> to vector<1x64xf32>
    %20 = vector.extract_strided_slice %18 {offsets = [0, 0], sizes = [1, 64], strides = [1, 1]} : vector<1x384xf32> to vector<1x64xf32>
    %21 = arith.addf %19, %20 : vector<1x64xf32>
    %22 = arith.negf %21 : vector<1x64xf32>
    %23 = math.exp %22 : vector<1x64xf32>
    %cst_14 = arith.constant 1.000000e+00 : f32
    %24 = vector.broadcast %cst_14 : f32 to vector<1x64xf32>
    %25 = arith.addf %24, %23 : vector<1x64xf32>
    %26 = arith.divf %24, %25 : vector<1x64xf32>
    %27 = vector.extract_strided_slice %14 {offsets = [0, 128], sizes = [1, 64], strides = [1, 1]} : vector<1x384xf32> to vector<1x64xf32>
    %28 = vector.extract_strided_slice %18 {offsets = [0, 128], sizes = [1, 64], strides = [1, 1]} : vector<1x384xf32> to vector<1x64xf32>
    %29 = arith.addf %27, %28 : vector<1x64xf32>
    %30 = arith.negf %29 : vector<1x64xf32>
    %31 = math.exp %30 : vector<1x64xf32>
    %cst_15 = arith.constant 1.000000e+00 : f32
    %32 = vector.broadcast %cst_15 : f32 to vector<1x64xf32>
    %33 = arith.addf %32, %31 : vector<1x64xf32>
    %34 = arith.divf %32, %33 : vector<1x64xf32>
    %35 = vector.extract_strided_slice %14 {offsets = [0, 256], sizes = [1, 64], strides = [1, 1]} : vector<1x384xf32> to vector<1x64xf32>
    %36 = vector.extract_strided_slice %18 {offsets = [0, 256], sizes = [1, 64], strides = [1, 1]} : vector<1x384xf32> to vector<1x64xf32>
    %37 = arith.mulf %26, %36 : vector<1x64xf32>
    %38 = arith.addf %35, %37 : vector<1x64xf32>
    %39 = math.tanh %38 : vector<1x64xf32>
    %cst_16 = arith.constant 1.000000e+00 : f32
    %40 = vector.broadcast %cst_16 : f32 to vector<1x64xf32>
    %41 = arith.subf %40, %34 : vector<1x64xf32>
    %42 = arith.mulf %41, %39 : vector<1x64xf32>
    %43 = arith.mulf %34, %10 : vector<1x64xf32>
    %44 = arith.addf %42, %43 : vector<1x64xf32>
    %c0_17 = arith.constant 0 : index
    %c0_18 = arith.constant 0 : index
    %45 = vector.load %arg12[%c0_17, %c0_18] : memref<1x64xf32, #tpu.memory_space<vmem>>, vector<1x64xf32>
    tpu.vector_store %arg12[%c0_17, %c0_18], %44 {strides = array<i32>} : memref<1x64xf32, #tpu.memory_space<vmem>>, vector<1x64xf32>,
    %c0_19 = arith.constant 0 : index
    %c0_20 = arith.constant 0 : index
    %46 = vector.load %arg8[%c0_19, %c0_20] : memref<64x128xf32, #tpu.memory_space<vmem>>, vector<64x128xf32>
    %cst_21 = arith.constant dense<0.000000e+00> : vector<1x128xf32>
    %47 = tpu.matmul %44, %46, %cst_21 {dimension_numbers = #tpu.dot_dimension_numbers<[1], [0], [0], [1], [0, 0, 1, 1], [], []>} : vector<1x64xf32>, vector<64x128xf32>, vector<1x128xf32> -> vector<1x128xf32>
    %c0_22 = arith.constant 0 : index
    %c0_23 = arith.constant 0 : index
    %48 = vector.load %arg9[%c0_22, %c0_23] : memref<1x128xf32, #tpu.memory_space<vmem>>, vector<1x128xf32>
    %49 = arith.addf %47, %48 : vector<1x128xf32>
    %cst_24 = arith.constant dense<0xFF800000> : vector<1xf32>
    %50 = vector.multi_reduction <maximumf>, %49, %cst_24 [1] : vector<1x128xf32> to vector<1xf32>
    %51 = vector.shape_cast %50 : vector<1xf32> to vector<1x1xf32>
    %52 = vector.broadcast %51 : vector<1x1xf32> to vector<1x128xf32>
    %53 = arith.subf %49, %52 : vector<1x128xf32>
    %54 = math.exp %53 : vector<1x128xf32>
    %cst_25 = arith.constant dense<0.000000e+00> : vector<1xf32>
    %55 = vector.multi_reduction <add>, %54, %cst_25 [1] : vector<1x128xf32> to vector<1xf32>
    %56 = vector.shape_cast %55 : vector<1xf32> to vector<1x1xf32>
    %57 = math.log %56 : vector<1x1xf32>
    %58 = arith.addf %51, %57 : vector<1x1xf32>
    %59 = vector.broadcast %58 : vector<1x1xf32> to vector<1x128xf32>
    %60 = arith.subf %49, %59 : vector<1x128xf32>
    %61 = vector.shape_cast %60 : vector<1x128xf32> to vector<1x1x128xf32>
    %c0_26 = arith.constant 0 : index
    %c0_27 = arith.constant 0 : index
    %c0_28 = arith.constant 0 : index
    %62 = vector.load %arg10[%c0_26, %c0_27, %c0_28] : memref<1x1x128xf32, #tpu.memory_space<vmem>>, vector<1x1x128xf32>
    tpu.vector_store %arg10[%c0_26, %c0_27, %c0_28], %61 {strides = array<i32>} : memref<1x1x128xf32, #tpu.memory_space<vmem>>, vector<1x1x128xf32>,
    %c7_i32 = arith.constant 7 : i32
    %63 = arith.cmpi eq, %arg0, %c7_i32 : i32
    %64 = arith.extui %63 : i1 to i32
    %c0_i32_29 = arith.constant 0 : i32
    %65 = arith.cmpi ne, %64, %c0_i32_29 : i32
    scf.if %65 {
      %c0_30 = arith.constant 0 : index
      %c0_31 = arith.constant 0 : index
      %66 = vector.load %arg11[%c0_30, %c0_31] : memref<1x64xf32, #tpu.memory_space<vmem>>, vector<1x64xf32>
      tpu.vector_store %arg11[%c0_30, %c0_31], %44 {strides = array<i32>} : memref<1x64xf32, #tpu.memory_space<vmem>>, vector<1x64xf32>,
    } else {
    }
    return
  }
  func.func @transform_0(%arg0: i32, %arg1: memref<8xi32, #tpu.memory_space<smem>>) -> (i32, i32) {
    %c0_i32 = arith.constant 0 : i32
    %c0_i32_0 = arith.constant 0 : i32
    %c0_i32_1 = arith.constant 0 : i32
    return %c0_i32, %c0_i32_0 : i32, i32
  }
  func.func @transform_1(%arg0: i32, %arg1: memref<8xi32, #tpu.memory_space<smem>>) -> (i32, i32, i32) {
    %c0_i32 = arith.constant 0 : i32
    %c0_i32_0 = arith.constant 0 : i32
    %c0_i32_1 = arith.constant 0 : i32
    %c0_i32_2 = arith.constant 0 : i32
    return %c0_i32, %c0_i32_0, %c0_i32_1 : i32, i32, i32
  }
  func.func @transform_2(%arg0: i32, %arg1: memref<8xi32, #tpu.memory_space<smem>>) -> (i32, i32) {
    %c0_i32 = arith.constant 0 : i32
    %c0_i32_0 = arith.constant 0 : i32
    %c0_i32_1 = arith.constant 0 : i32
    return %c0_i32, %c0_i32_0 : i32, i32
  }
  func.func @transform_3(%arg0: i32, %arg1: memref<8xi32, #tpu.memory_space<smem>>) -> (i32, i32) {
    %c0_i32 = arith.constant 0 : i32
    %c0_i32_0 = arith.constant 0 : i32
    %c0_i32_1 = arith.constant 0 : i32
    return %c0_i32, %c0_i32_0 : i32, i32
  }
  func.func @transform_4(%arg0: i32, %arg1: memref<8xi32, #tpu.memory_space<smem>>) -> (i32, i32) {
    %c0_i32 = arith.constant 0 : i32
    %c0_i32_0 = arith.constant 0 : i32
    %c0_i32_1 = arith.constant 0 : i32
    return %c0_i32, %c0_i32_0 : i32, i32
  }
  func.func @transform_5(%arg0: i32, %arg1: memref<8xi32, #tpu.memory_space<smem>>) -> (i32, i32) {
    %c0_i32 = arith.constant 0 : i32
    %c0_i32_0 = arith.constant 0 : i32
    %c0_i32_1 = arith.constant 0 : i32
    return %c0_i32, %c0_i32_0 : i32, i32
  }
  func.func @transform_6(%arg0: i32, %arg1: memref<8xi32, #tpu.memory_space<smem>>) -> (i32, i32) {
    %c0_i32 = arith.constant 0 : i32
    %c0_i32_0 = arith.constant 0 : i32
    %c0_i32_1 = arith.constant 0 : i32
    return %c0_i32, %c0_i32_0 : i32, i32
  }
  func.func @transform_7(%arg0: i32, %arg1: memref<8xi32, #tpu.memory_space<smem>>) -> (i32, i32) {
    %c0_i32 = arith.constant 0 : i32
    %c0_i32_0 = arith.constant 0 : i32
    %c0_i32_1 = arith.constant 0 : i32
    return %c0_i32, %c0_i32_0 : i32, i32
  }
  func.func @transform_8(%arg0: i32, %arg1: memref<8xi32, #tpu.memory_space<smem>>) -> (i32, i32, i32) {
    %c0_i32 = arith.constant 0 : i32
    %c0_i32_0 = arith.constant 0 : i32
    %c0_i32_1 = arith.constant 0 : i32
    return %arg0, %c0_i32, %c0_i32_0 : i32, i32, i32
  }
  func.func @transform_9(%arg0: i32, %arg1: memref<8xi32, #tpu.memory_space<smem>>) -> (i32, i32) {
    %c0_i32 = arith.constant 0 : i32
    %c0_i32_0 = arith.constant 0 : i32
    %c0_i32_1 = arith.constant 0 : i32
    return %c0_i32, %c0_i32_0 : i32, i32
  }
}

</mosaic_0001>

<bundles_post_ra>
// kernel: tpu_custom_call.1
= control target key start
LH: loop header
LB: loop body
LE: loop exit
PB: predicated region body
PF: predicated region fallthrough
CT: control target
= control target key end

     0   :  { %s1906_s0 = inlined_call_operand.hbm [shape: s32[8], index: 0, kind: input, shape index: {}]   ;;  %s1907_s1 = inlined_call_operand.vmem [shape: f32[1,64], index: 1, kind: input, shape index: {}]   ;;  %s1908_s2 = inlined_call_operand.hbm [shape: f32[24,1,64], index: 2, kind: input, shape index: {}]   ;;  %s1909_s3 = inlined_call_operand.hbm [shape: f32[64,384], index: 3, kind: input, shape index: {}]   ;;  %s1910_s4 = inlined_call_operand.vmem [shape: f32[1,384], index: 4, kind: input, shape index: {}]   ;;  %s1911_s5 = inlined_call_operand.hbm [shape: f32[64,384], index: 5, kind: input, shape index: {}]   ;;  %s1912_s6 = inlined_call_operand.vmem [shape: f32[1,384], index: 6, kind: input, shape index: {}]   ;;  %s1913_s7 = inlined_call_operand.hbm [shape: f32[64,128], index: 7, kind: input, shape index: {}]   ;;  %s1914_s8 = inlined_call_operand.vmem [shape: f32[1,128], index: 8, kind: input, shape index: {}]   ;;  %s1915_s9 = inlined_call_operand.hbm [shape: f32[8,1,128], index: 9, kind: output, shape index: {0}]   ;;  %s1916_s10 = inlined_call_operand.hbm [shape: f32[1,64], index: 10, kind: output, shape index: {1}]  }
   0x1   :  { %1927 = sst [smem:[#allocation26_spill]] %s1909_s3  ;;  %s1295_s15 = scalar_lea.hbm %s1906_s0, 16 }
   0x2   :  { %p1296_p0 = scmp.ne.s32.totalorder %s1906_s0, %s1295_s15  ;;  %p1299_p1 = scmp.lt.u32.totalorder %s1295_s15, %s1906_s0 }
   0x4   :  { %p1301_p2 = pnand %p1299_p1, %p1296_p0 }
   0x6   :  { %1304 = shalt.err (!%p1301_p2)  }
   0x7   :  { %s1525_s20 = smov [#allocation4]  }
   0x8   :  { %17 = dma.hbm_to_smem %s1906_s0, 16, %s1525_s20, [#allocation3] }
   0x9   :  { %1487 = dma.done.wait [#allocation3], 16 }
   0xa   :  { %1488 = vsyncadd [#allocation3], 4294967280 }
   0xb   :  { %19 = sfence }
   0xc   :  { %20 = vsyncpa [#allocation6], 0 }
   0xd   :  { %21 = vsyncpa [#allocation9], 0 }
   0xe   :  { %22 = vsyncpa [#allocation12], 0 }
   0xf   :  { %23 = vsyncpa [#allocation7], 0 }
  0x10   :  { %25 = vsyncpa [#allocation7 + $0x1], 0 }
  0x11   :  { %26 = vsyncpa [#allocation15], 0  ;;  %s1608_s23 = smov 0   ;;  %s1610_s24 = smov 0  }
  0x12   :  { %s1612_s25 = smov 0   ;;  %s1614_s26 = smov 0  }
  0x13 LB: > { %1928 = sst [smem:[#allocation22_spill]] %s1519_s25  ;;  %s1629_s0 = sadd.s32 4294967295, %s1523_s26   ;;  %s1523_s26 = sphi %s1614_s26, %s1956_s26   ;;  %s1519_s25 = sphi %s1612_s25, %s1958_s25   ;;  %s1515_s24 = sphi %s1610_s24, %s1960_s24   ;;  %s1511_s23 = sphi %s1608_s23, %s1959_s23  }
  0x14   : > { %s1001_s27 = sadd.s32 4294967294, %s1523_s26   ;;  %s1633_s28 = sadd.s32 1, %s1523_s26  }
  0x15   : > { %1929 = sst [smem:[#allocation23_spill]] %s1633_s28  ;;  %s207_s29 = sadd.s32 1, %s1519_s25 }
  0x16   : > { %s204_s30 = ssub.s32 %s1523_s26, %s1633_s28  ;;  %p217_p3 = scmp.ne.s32.totalorder %s1519_s25, %s1515_s24 }
  0x17   : > { %p205_p4 = scmp.eq.s32.totalorder %s204_s30, 0  ;;  %p1917_p5 = scmp.eq.s32.totalorder %s1629_s0, 7 }
  0x18   : > { %p223_p6 = scmp.ne.s32.totalorder %s1515_s24, %s1511_s23  ;;  %p224_p7 = scmp.eq.s32.totalorder %s1001_s27, 7 }
  0x19   : > { %s1644_s11 = scalar_select %p205_p4, %s1519_s25, %s207_s29  }
  0x1a   : > { %p1648_p8 = por %p1917_p5, %p217_p3  ;;  %p1652_p9 = por %p224_p7, %p223_p6 }
  0x1b   : > { %1930 = sst [smem:[#allocation24_spill]] %s1644_s11  ;;  %p1002_p10 = scmp.ge.s32.totalorder %s1523_s26, 1 }
  0x1c   : > { %s1931_s12 = scalar_select %p1648_p8, 1, 0 }
  0x1d   : > { %s1932_s13 = scalar_select %p1652_p9, 1, 0 }
  0x1e   : > { %p252_p11 = scmp.lt.s32.totalorder %s1523_s26, 9  ;;  %p1918_p13 = scmp.eq.s32.totalorder %s1629_s0, 0 }
  0x1f   : > { %1933 = sst [smem:[#allocation25_spill]] %s1932_s13  ;;  %s1526_s15 = smov [#allocation8]  }
  0x20   : > { %p1660_p0 = pnand %p1002_p10, %p252_p11  ;;  %s280_s16 = sshll.u32 %s1526_s15, 4  ;;  %s281_s16 = int_to_ptr.vmem [resolvable:$true] %s280_s16 }
  0x21   : > { %s1527_s18 = smov [#allocation5]   ;;  %s1936_s3 = sld [smem:[#allocation26_spill]] }
  0x22   : > { %s1934_s14 = scalar_select %p1660_p0, 1, 0 }
  0x23   : > { %p1206_p1 = pneg %p1660_p0  ;;  %s267_s19 = sshll.u32 %s1527_s18, 4  ;;  %s1672_s19 = int_to_ptr.vmem [resolvable:$true] %s267_s19 }
  0x25   : > { %p1668_p2 = pnand %p1918_p13, %p1206_p1 }
  0x27   : > { %s1305_s22 = scalar_lea.hbm %s1936_s3, 3072  ;;  %p1682_p4 = pneg %p1668_p2 }
  0x28   : > { %p1306_p3 = scmp.ne.s32.totalorder %s1936_s3, %s1305_s22  ;;  %p1312_p10 = scmp.lt.u32.totalorder %s1305_s22, %s1936_s3 }
  0x2a   : > { %p1308_p6 = pnand %p1682_p4, %p1306_p3 }
  0x2c   : > { %p1309_p7 = pneg %p1308_p6 }
  0x2e   : > { %p1314_p11 = pnand %p1312_p10, %p1309_p7 }
  0x30   : > { %1317 = shalt.err (!%p1314_p11)
}
  0x31   : > { %s1318_s20 = scalar_lea.vmem %s281_s16, 3072  ;;  %p1326_p13 = scmp.lt.s32.totalorder %s281_s16, %s281_s16 }
  0x32   : > { %p1319_p1 = scmp.ne.s32.totalorder %s281_s16, %s1318_s20  ;;  %p1327_p9 = scmp.lt.s32.totalorder %s1318_s20, %s1318_s20 }
  0x34   : > { %p1321_p5 = pnand %p1319_p1, %p1682_p4  ;;  %p1328_p8 = por %p1327_p9, %p1326_p13 }
  0x36   : > { %p1322_p12 = pneg %p1321_p5 }
  0x38   : > { %p1329_p0 = pnand %p1328_p8, %p1322_p12 }
  0x3a   : > { %1332 = shalt.err (!%p1329_p0)
}
  0x3b   : > { %s1925_s21 = smov 384   ;;  %s1926_s27 = smov 24  }
  0x3c   : > { %1212 = dma.hbm_to_vmem [thread:$0]  (!%p1668_p2), %s1936_s3, 3072, %s281_s16, [#allocation9], %s1925_s21, %s1925_s21, %s1926_s27  }
  0x3d   : > { %s1333_s11 = scalar_lea.hbm %s1908_s2, 384 }
  0x3e   : > { %p1334_p5 = scmp.ne.s32.totalorder %s1908_s2, %s1333_s11  ;;  %p1340_p12 = scmp.lt.u32.totalorder %s1333_s11, %s1908_s2 }
  0x40   : > { %p1336_p8 = pnand %p1334_p5, %p1682_p4 }
  0x42   : > { %p1337_p9 = pneg %p1336_p8 }
  0x44   : > { %p1342_p13 = pnand %p1340_p12, %p1337_p9 }
  0x46   : > { %1345 = shalt.err (!%p1342_p13)
}
  0x47   : > { %s1346_s16 = scalar_lea.vmem %s1672_s19, 384  ;;  %p1354_p7 = scmp.lt.s32.totalorder %s1672_s19, %s1672_s19 }
  0x48   : > { %p1347_p0 = scmp.ne.s32.totalorder %s1672_s19, %s1346_s16  ;;  %p1355_p10 = scmp.lt.s32.totalorder %s1346_s16, %s1346_s16 }
  0x4a   : > { %p1349_p3 = pnand %p1347_p0, %p1682_p4  ;;  %p1356_p11 = por %p1355_p10, %p1354_p7 }
  0x4c   : > { %p1350_p6 = pneg %p1349_p3 }
  0x4e   : > { %p1357_p1 = pnand %p1356_p11, %p1350_p6 }
  0x50   : > { %1360 = shalt.err (!%p1357_p1)
}
  0x51   : > { %s1530_s25 = smov 16   ;;  %s1531_s28 = smov 1  }
  0x52   : > { %1209 = dma.hbm_to_vmem [thread:$0]  (!%p1668_p2), %s1908_s2, 384, %s1672_s19, [#allocation6], %s1530_s25, %s1530_s25, %s1531_s28  }
  0x53   : > { %s1532_s22 = smov [#allocation10]   ;;  %s1533_s15 = smov [#allocation11]  }
  0x54   : > { %s296_s29 = sshll.u32 %s1532_s22, 4  ;;  %s312_s18 = sshll.u32 %s1533_s15, 4  ;;  %s297_s29 = int_to_ptr.vmem [resolvable:$true] %s296_s29  ;;  %s1724_s18 = int_to_ptr.vmem [resolvable:$true] %s312_s18 }
  0x55   : > { %s1361_s21 = scalar_lea.hbm %s1911_s5, 3072 }
  0x56   : > { %p1362_p5 = scmp.ne.s32.totalorder %s1911_s5, %s1361_s21  ;;  %p1368_p12 = scmp.lt.u32.totalorder %s1361_s21, %s1911_s5 }
  0x58   : > { %p1364_p8 = pnand %p1362_p5, %p1682_p4 }
  0x5a   : > { %p1365_p9 = pneg %p1364_p8 }
  0x5c   : > { %p1370_p13 = pnand %p1368_p12, %p1365_p9 }
  0x5e   : > { %1373 = shalt.err (!%p1370_p13)
}
  0x5f   : > { %s1374_s25 = scalar_lea.vmem %s297_s29, 3072  ;;  %p1382_p7 = scmp.lt.s32.totalorder %s297_s29, %s297_s29 }
  0x60   : > { %p1375_p0 = scmp.ne.s32.totalorder %s297_s29, %s1374_s25  ;;  %p1383_p10 = scmp.lt.s32.totalorder %s1374_s25, %s1374_s25 }
  0x62   : > { %p1377_p3 = pnand %p1375_p0, %p1682_p4  ;;  %p1384_p11 = por %p1383_p10, %p1382_p7 }
  0x64   : > { %p1378_p6 = pneg %p1377_p3 }
  0x66   : > { %p1385_p1 = pnand %p1384_p11, %p1378_p6 }
  0x68   : > { %1388 = shalt.err (!%p1385_p1)
}
  0x69   : > { %s1938_s3 = smov 24   ;;  %s1939_s27 = smov 384  }
  0x6a   : > { %1215 = dma.hbm_to_vmem [thread:$0]  (!%p1668_p2), %s1911_s5, 3072, %s297_s29, [#allocation9], %s1939_s27, %s1939_s27, %s1938_s3  }
  0x6b   : > { %s1389_s15 = scalar_lea.hbm %s1913_s7, 1024 }
  0x6c   : > { %p1390_p5 = scmp.ne.s32.totalorder %s1913_s7, %s1389_s15  ;;  %p1396_p12 = scmp.lt.u32.totalorder %s1389_s15, %s1913_s7 }
  0x6e   : > { %p1392_p8 = pnand %p1390_p5, %p1682_p4 }
  0x70   : > { %p1393_p9 = pneg %p1392_p8 }
  0x72   : > { %p1398_p13 = pnand %p1396_p12, %p1393_p9 }
  0x74   : > { %1401 = shalt.err (!%p1398_p13)
}
  0x75   : > { %s1402_s29 = scalar_lea.vmem %s1724_s18, 1024  ;;  %p1410_p7 = scmp.lt.s32.totalorder %s1724_s18, %s1724_s18 }
  0x76   : > { %p1403_p0 = scmp.ne.s32.totalorder %s1724_s18, %s1402_s29  ;;  %p1411_p10 = scmp.lt.s32.totalorder %s1402_s29, %s1402_s29 }
  0x78   : > { %p1405_p3 = pnand %p1403_p0, %p1682_p4  ;;  %p1412_p11 = por %p1411_p10, %p1410_p7 }
  0x7a   : > { %p1406_p6 = pneg %p1405_p3 }
  0x7c   : > { %p1413_p1 = pnand %p1412_p11, %p1406_p6 }
  0x7e   : > { %1416 = shalt.err (!%p1413_p1)
}
  0x7f   : > { %s1534_s25 = smov 128   ;;  %s1535_s3 = smov 8  }
  0x80   : > { %1218 = dma.hbm_to_vmem [thread:$0]  (!%p1668_p2), %s1913_s7, 1024, %s1724_s18, [#allocation12], %s1534_s25, %s1534_s25, %s1535_s3  }
  0x81   : > { %p1940_p5 = scmp.ne.s32.totalorder %s1934_s14, 0 }
  0x82   : > { %p1941_p4 = scmp.eq.s32.totalorder (!%p1940_p5), %s1629_s0, 0 }
  0x83   : > { %331 = sbr.rel (%p1940_p5) target bundleno = 1035 (0x40b), region = 52 }
  0x8a   : > { %1490 = dma.done.wait (%p1941_p4), [#allocation6], 384   ;;  %p1942_p8 = pmov %p1941_p4 }
  0x8b   : > { %p1943_p9 = pmov %p1941_p4 }
  0x8c   : > { %1492 = vsyncadd (%p1942_p8), [#allocation6], 4294966912 }
  0x8d   : > { %1494 = dma.done.wait (%p1943_p9), [#allocation9], 6144   ;;  %p1944_p12 = pmov %p1941_p4 }
  0x8e   : > { %p1945_p13 = pmov %p1941_p4 }
  0x8f   : > { %1496 = vsyncadd (%p1944_p12), [#allocation9], 4294961152 }
  0x90   : > { %1498 = dma.done.wait (%p1945_p13), [#allocation12], 1024   ;;  %p1946_p2 = pmov %p1941_p4 }
  0x91   : > { %s369_s14 = sand.u32 1, %s1515_s24   ;;  %p1947_p0 = scmp.ne.s32.totalorder %s1629_s0, 0 }
  0x92   : > { %1500 = vsyncadd (%p1946_p2), [#allocation12], 4294966272  ;;  %s1787_s17 = scalar_lea.vmem [#allocation13], %s369_s14  ;;  %v377_v0 = vld [vmem:[%s1907_s1] sm:$0x1] (!%p1947_p0)  ;;  %vm378_vm0 = vcmask (!%p1947_p0), 516096  }
  0x93   : > { %376 = sbr.rel (%p1947_p0) target bundleno = 154 (0x9a), region = 72  ;;  %379 = vst.msk [vmem:[#allocation2] sm:$0x1] (!%p1947_p0), %vm378_vm0, %v377_v0 }
  0x9a PF: > { %v386_v1 = vld [vmem:[#allocation8 + $0x8] sm:$0xff]  ;;  %v389_v2 = vld [vmem:[#allocation8 + $0x20] sm:$0xff]  ;;  %v388_v5 = vld [vmem:[#allocation8 + $0x18] sm:$0xff]  ;;  %v1536_v8 = vmov 0.0   ;;  %s1796_s21 = sld [smem:[#allocation4 + %s1629_s0]]  ;;  %v1537_v14 = vmov 0.0|0.0  }
  0x9b   : > { %v385_v3 = vld [vmem:[#allocation8] sm:$0xff]  ;;  %v1110_v4 = vpack.c.bf16 %v389_v2, %v386_v1  ;;  %v392_v6 = vld [vmem:[#allocation8 + $0x38] sm:$0xff]  ;;  %v395_v7 = vld [vmem:[#allocation8 + $0x50] sm:$0xff]  ;;  %494 = vmatprep.mubr.f32.mxu0 %v1536_v8  ;;  %1126 = vmatprep.subr.bf16.mxu1 %v1537_v14  ;;  %vm1538_vm1 = vmmov 0   ;;  %vm426_vm2 = vcmask 523264   ;;  %vm777_vm3 = vcmask 516096  }
  0x9c   : > { %v1112_v9 = vpack.c.bf16 %v388_v5, %v385_v3  ;;  %v1114_v10 = vpack.c.bf16 %v395_v7, %v392_v6  ;;  %v391_v11 = vld [vmem:[#allocation8 + $0x30] sm:$0xff]  ;;  %v394_v12 = vld [vmem:[#allocation8 + $0x48] sm:$0xff]  ;;  %1069 = vmatprep.mubr.msk.f32.mxu1 %vm1538_vm1, %v1536_v8  ;;  %v401_v15 = vld [vmem:[#allocation8 + $0x80] sm:$0xff]  ;;  %vm861_vm4 = vcmask 1040384   ;;  %p1020_p3 = scmp.ne.s32.totalorder %s1629_s0, 7 }
  0x9d   : > { %v398_v13 = vld [vmem:[#allocation8 + $0x68] sm:$0xff]  ;;  %1111 = vmatprep.subr.bf16.mxu0 %v1110_v4  ;;  %v1116_v16 = vpack.c.bf16 %v394_v12, %v391_v11  ;;  %v397_v18 = vld [vmem:[#allocation8 + $0x60] sm:$0xff]  ;;  %v400_v19 = vld [vmem:[#allocation8 + $0x78] sm:$0xff] }
  0x9e   : > { %1113 = vmatpush1.bf16.msra.mxu0 %v1112_v9  ;;  %v1118_v17 = vpack.c.bf16 %v401_v15, %v398_v13  ;;  %v404_v20 = vld [vmem:[#allocation8 + $0x98] sm:$0xff]  ;;  %v407_v21 = vld [vmem:[#allocation8 + $0xb0] sm:$0xff]  ;;  %v1120_v22 = vpack.c.bf16 %v400_v19, %v397_v18  ;;  %v406_v25 = vld [vmem:[#allocation8 + $0xa8] sm:$0xff] }
  0x9f   : > { %1115 = vmatprep.subr.bf16.mxu0 %v1114_v10  ;;  %v1122_v23 = vpack.c.bf16 %v407_v21, %v404_v20  ;;  %v403_v24 = vld [vmem:[#allocation8 + $0x90] sm:$0xff]  ;;  %v572_v27 = vld [vmem:[#allocation10 + $0x8] sm:$0xff]  ;;  %v575_v28 = vld [vmem:[#allocation10 + $0x20] sm:$0xff] }
  0xa0   : > { %v387_v26 = vld [vmem:[#allocation8 + $0x10] sm:$0xff]  ;;  %v390_v29 = vld [vmem:[#allocation8 + $0x28] sm:$0xff]  ;;  %v393_v31 = vld [vmem:[#allocation8 + $0x40] sm:$0xff]  ;;  %v1124_v32 = vpack.c.bf16 %v406_v25, %v403_v24  ;;  %s381_s13 = scalar_lea.vmem [#allocation5], %s1796_s21  ;;  %v1138_v35 = vpack.c.bf16 %v575_v28, %v572_v27  ;;  %v411_v27 = vlaneseq }
  0xa1   : > { %v1127_v30 = vpack.c.bf16 %v390_v29, %v387_v26  ;;  %v382_v33 = vld [vmem:[%s381_s13] sm:$0x1]  ;;  %v396_v34 = vld [vmem:[#allocation8 + $0x58] sm:$0xff]  ;;  %v571_v36 = vld [vmem:[#allocation10] sm:$0xff] }
  0xa2   : > { %1117 = vmatpush1.bf16.msra.mxu0 %v1116_v16  ;;  %v574_v37 = vld [vmem:[#allocation10 + $0x18] sm:$0xff]  ;;  %v1130_v39 = vpack.c.bf16 %v396_v34, %v393_v31  ;;  %v581_v40 = vld [vmem:[#allocation10 + $0x50] sm:$0xff]  ;;  %v402_v42 = vld [vmem:[#allocation8 + $0x88] sm:$0xff]  ;;  %v383_v43 = vmax.f32 %v382_v33, 0.0  ;;  %v412_v28 = vshrl.u32 %v411_v27, 7 }
  0xa3   : > { %1119 = vmatprep.subr.bf16.mxu0 %v1118_v17  ;;  %v578_v38 = vld [vmem:[#allocation10 + $0x38] sm:$0xff]  ;;  %1128 = vmatpush3.bf16.msra.mxu1 %v1127_v30  ;;  %v399_v41 = vld [vmem:[#allocation8 + $0x70] sm:$0xff]  ;;  %v1140_v44 = vpack.c.bf16 %v574_v37, %v571_v36  ;;  %v580_v47 = vld [vmem:[#allocation10 + $0x48] sm:$0xff] }
  0xa4   : > { %1129 = vmatprep.subr.bf16.mxu1 %v1537_v14  ;;  %v1142_v45 = vpack.c.bf16 %v581_v40, %v578_v38  ;;  %v577_v46 = vld [vmem:[#allocation10 + $0x30] sm:$0xff]  ;;  %v584_v48 = vld [vmem:[#allocation10 + $0x68] sm:$0xff]  ;;  %v1133_v49 = vpack.c.bf16 %v402_v42, %v399_v41  ;;  %v587_v50 = vld [vmem:[#allocation10 + $0x80] sm:$0xff]  ;;  %v413_v29 = vsub.s32 0, %v412_v28 }
  0xa5   : > { %v405_v51 = vld [vmem:[#allocation8 + $0xa0] sm:$0xff]  ;;  %v408_v52 = vld [vmem:[#allocation8 + $0xb8] sm:$0xff]  ;;  %v1144_v53 = vpack.c.bf16 %v580_v47, %v577_v46  ;;  %v1146_v54 = vpack.c.bf16 %v587_v50, %v584_v48  ;;  %v593_v59 = vld [vmem:[#allocation10 + $0xb0] sm:$0xff]  ;;  %v421_v50 = vsub.s32 2, %v412_v28 }
  0xa6   : > { %1121 = vmatpush1.bf16.msra.mxu0 %v1120_v22  ;;  %v583_v55 = vld [vmem:[#allocation10 + $0x60] sm:$0xff]  ;;  %v586_v56 = vld [vmem:[#allocation10 + $0x78] sm:$0xff]  ;;  %v1136_v58 = vpack.c.bf16 %v408_v52, %v405_v51  ;;  %v573_v60 = vld [vmem:[#allocation10 + $0x10] sm:$0xff] }
  0xa7   : > { %1123 = vmatprep.subr.bf16.mxu0 %v1122_v23  ;;  %1131 = vmatpush3.bf16.msra.mxu1 %v1130_v39  ;;  %v590_v57 = vld [vmem:[#allocation10 + $0x98] sm:$0xff]  ;;  %v576_v61 = vld [vmem:[#allocation10 + $0x28] sm:$0xff]  ;;  %v1148_v62 = vpack.c.bf16 %v586_v56, %v583_v55  ;;  %v589_v0 = vld [vmem:[#allocation10 + $0x90] sm:$0xff] }
  0xa8   : > { %1132 = vmatprep.subr.bf16.mxu1 %v1537_v14  ;;  %v1150_v63 = vpack.c.bf16 %v593_v59, %v590_v57  ;;  %v592_v1 = vld [vmem:[#allocation10 + $0xa8] sm:$0xff]  ;;  %v1155_v2 = vpack.c.bf16 %v576_v61, %v573_v60  ;;  %v579_v3 = vld [vmem:[#allocation10 + $0x40] sm:$0xff]  ;;  %v582_v4 = vld [vmem:[#allocation10 + $0x58] sm:$0xff] }
  0xa9   : > { %v1152_v5 = vpack.c.bf16 %v592_v1, %v589_v0  ;;  %v1158_v6 = vpack.c.bf16 %v582_v4, %v579_v3  ;;  %v585_v7 = vld [vmem:[#allocation10 + $0x70] sm:$0xff]  ;;  %v588_v9 = vld [vmem:[#allocation10 + $0x88] sm:$0xff]  ;;  %v1812_v10 = vld [vmem:[#allocation2] sm:$0x1] }
  0xaa   : > { %1125 = vmatpush1.bf16.msra.mxu0 %v1124_v32  ;;  %v1161_v11 = vpack.c.bf16 %v588_v9, %v585_v7  ;;  %v591_v12 = vld [vmem:[#allocation10 + $0xa0] sm:$0xff]  ;;  %v594_v13 = vld [vmem:[#allocation10 + $0xb8] sm:$0xff]  ;;  %v780_v17 = vld [vmem:[#allocation11 + $0x8] sm:$0xff]  ;;  %v417_v32 = vsub.s32 1, %v412_v28 }
  0xab   : > { %1139 = vmatprep.subr.bf16.mxu0 %v1138_v35  ;;  %1134 = vmatpush3.bf16.msra.mxu1 %v1133_v49  ;;  %v1164_v15 = vpack.c.bf16 %v594_v13, %v591_v12  ;;  %v779_v16 = vld [vmem:[#allocation11] sm:$0xff]  ;;  %v781_v19 = vld [vmem:[#allocation11 + $0x10] sm:$0xff]  ;;  %v782_v20 = vld [vmem:[#allocation11 + $0x18] sm:$0xff] }
  0xac   : > { %1135 = vmatprep.subr.bf16.mxu1 %v1537_v14  ;;  %v1167_v18 = vpack.c.bf16 %v780_v17, %v779_v16  ;;  %v1170_v21 = vpack.c.bf16 %v782_v20, %v781_v19  ;;  %v783_v22 = vld [vmem:[#allocation11 + $0x20] sm:$0xff]  ;;  %v784_v23 = vld [vmem:[#allocation11 + $0x28] sm:$0xff]  ;;  %v785_v24 = vld [vmem:[#allocation11 + $0x30] sm:$0xff] }
  0xad   : > { %1013 = vmatmul.mubr.msk.f32.vlgmr.msra.gmra.mrb[0].mxu0 %vm426_vm2, %v383_v43  ;;  %v786_v25 = vld [vmem:[#allocation11 + $0x38] sm:$0xff] }
  0xae   : > { %1141 = vmatpush1.bf16.msra.mxu0 %v1140_v44  ;;  %679 = vmatprep.mubr.f32.mxu0 %v1536_v8  ;;  %v1176_v26 = vpack.c.bf16 %v786_v25, %v785_v24  ;;  %v409_v30 = vld [vmem:[%s1910_s4] sm:$0x7] }
  0xaf   : > { %1143 = vmatprep.subr.bf16.mxu0 %v1142_v45  ;;  %1137 = vmatpush3.bf16.msra.mxu1 %v1136_v58  ;;  %v595_v31 = vld [vmem:[%s1912_s6] sm:$0x7]  ;;  %v414_v33 = vrot.slane %v409_v30, %v413_v29  ;;  %v418_v37 = vrot.slane %v409_v30, %v417_v32 }
  0xb0   : > { %1154 = vmatprep.subr.bf16.mxu1 %v1537_v14  ;;  %v600_v34 = vrot.slane %v595_v31, %v413_v29  ;;  %v604_v38 = vrot.slane %v595_v31, %v417_v32  ;;  %v608_v51 = vrot.slane %v595_v31, %v421_v50 }
  0xb2   : > { %1145 = vmatpush1.bf16.msra.mxu0 %v1144_v53  ;;  %1070 = vmatmul.mubr.msk.f32.vlgmr.msra.gmra.mrb[0].mxu1 %vm426_vm2, %v383_v43  ;;  %v1180_v40 = vadd.f32 %v604_v38, %v418_v37 }
  0xb3   : > { %1147 = vmatprep.subr.bf16.mxu0 %v1146_v54  ;;  %1156 = vmatpush3.bf16.msra.mxu1 %v1155_v2  ;;  %v422_v54 = vrot.slane %v409_v30, %v421_v50  ;;  %v787_v2 = vld [vmem:[%s1914_s8] sm:$0x1] }
  0xb4   : > { %1157 = vmatprep.subr.bf16.mxu1 %v1537_v14  ;;  %1088 = vmatprep.mubr.msk.f32.mxu1 %vm1538_vm1, %v1536_v8 }
  0xb6   : > { %1149 = vmatpush1.bf16.msra.mxu0 %v1148_v62 }
  0xb7   : > { %1151 = vmatprep.subr.bf16.mxu0 %v1150_v63  ;;  %1159 = vmatpush3.bf16.msra.mxu1 %v1158_v6 }
  0xb8   : > { %1160 = vmatprep.subr.bf16.mxu1 %v1537_v14 }
  0xba   : > { %1153 = vmatpush1.bf16.msra.mxu0 %v1152_v5 }
  0xbb   : > { %1166 = vmatprep.subr.bf16.mxu0 %v1537_v14  ;;  %1162 = vmatpush3.bf16.msra.mxu1 %v1161_v11 }
  0xbc   : > { %1163 = vmatprep.subr.bf16.mxu1 %v1537_v14 }
  0xbd   : > { %1015 = vmatmul.mubr.msk.f32.vlgmr.msra.gmra.mrb[0].mxu0 %vm426_vm2, %v1812_v10 }
  0xbe   : > { %1107 = vmatprep.mubr.msk.f32.mxu0 %vm1538_vm1, %v1536_v8  ;;  %1168 = vmatpush3.bf16.msra.mxu0 %v1167_v18  ;;  %v1173_v8 = vpack.c.bf16 %v784_v23, %v783_v22 }
  0xbf   : > { %1165 = vmatpush3.bf16.msra.mxu1 %v1164_v15  ;;  %1169 = vmatprep.subr.bf16.mxu0 %v1537_v14 }
  0xc2   : > { %1089 = vmatmul.mubr.msk.f32.vlgmr.msra.gmra.mrb[2].mxu1 %vm426_vm2, %v1812_v10  ;;  %1171 = vmatpush3.bf16.msra.mxu0 %v1170_v21 }
  0xc3   : > { %1172 = vmatprep.subr.bf16.mxu0 %v1537_v14 }
  0xc6   : > { %1174 = vmatpush3.bf16.msra.mxu0 %v1173_v8 }
  0xc7   : > { %1175 = vmatprep.subr.bf16.mxu0 %v1537_v14  ;;  %v1178_v14 = vadd.f32 %v600_v34, %v414_v33 }
  0xca   : > { %1177 = vmatpush3.bf16.msra.mxu0 %v1176_v26 }
 0x185   : > { %v567_v35 = vpop.f32.mrb[0].mxu1 }
 0x186   : > { %v1071_v36 = vpop.f32.mrb[1].mxu1  ;;  %v568_v57 = vadd.f32 %v567_v35, %v422_v54 }
 0x190   : > { %v681_v39 = vpop.f32.mrb[0].mxu0 }
 0x191   : > { %v1179_v41 = vadd.f32 %v1178_v14, %v681_v39  ;;  %v683_v42 = vpop.f32.mrb[1].mxu0 }
 0x192   : > { %v1181_v44 = vadd.f32 %v1180_v40, %v683_v42 }
 0x193   : > { %v1017_v43 = vmul.f32 -1.442695, %v1179_v41 }
 0x194   : > { %v1018_v45 = vmul.f32 -1.442695, %v1181_v44 }
 0x195   : > { %1281 = vpow2.f32 %v1017_v43  ;;  %v752_v46 = vpop.f32.mrb[2].mxu1 }
 0x196   : > { %v1090_v47 = vpop.f32.mrb[3].mxu1  ;;  %1283 = vpow2.f32 %v1018_v45  ;;  %v753_v55 = vadd.f32 %v752_v46, %v608_v51 }
 0x19f   : > { %v1282_v48 = vpop.eup %1281 }
 0x1a0   : > { %v760_v49 = vadd.f32 1.0, %v1282_v48  ;;  %v1284_v52 = vpop.eup %1283 }
 0x1a1   : > { %v767_v53 = vadd.f32 1.0, %v1284_v52 }
 0x1a2   : > { %1285 = vrcp.f32 %v760_v49 }
 0x1a3   : > { %1287 = vrcp.f32 %v767_v53 }
 0x1ac   : > { %v1286_v56 = vpop.eup %1285 }
 0x1ad   : > { %v770_v58 = vmul.f32 %v1286_v56, %v753_v55  ;;  %v1288_v60 = vpop.eup %1287 }
 0x1ae   : > { %v773_v61 = vsub.f32 1.0, %v1288_v60  ;;  %v775_v0 = vmul.f32 %v1288_v60, %v1812_v10 }
 0x1af   : > { %v771_v59 = vadd.f32 %v770_v58, %v568_v57 }
 0x1b1   : > { %1289 = vtanh.f32 %v771_v59 }
 0x1bb   : > { %v1290_v62 = vpop.eup %1289 }
 0x1bc   : > { %v774_v63 = vmul.f32 %v1290_v62, %v773_v61 }
 0x1be   : > { %v776_v1 = vadd.f32 %v775_v0, %v774_v63 }
 0x1c0   : > { %778 = vst.msk [vmem:[#allocation2] sm:$0x1] %vm777_vm3, %v776_v1  ;;  %1108 = vmatmul.mubr.msk.f32.vlgmr.msra.gmra.mrb[2].mxu0 %vm426_vm2, %v776_v1  ;;  %880 = vst.msk [vmem:[#allocation14] sm:$0x1] (!%p1020_p3), %vm777_vm3, %v776_v1 }
 0x293   : > { %v857_v3 = vpop.f32.mrb[2].mxu0 }
 0x294   : > { %v858_v4 = vadd.f32 %v857_v3, %v787_v2  ;;  %v1109_v5 = vpop.f32.mrb[3].mxu0 }
 0x296   : > { %v862_v6 = vsel %vm861_vm4, %v858_v4, -inf }
 0x297   : > { %863 = vmax.xlane.f32.xlu0 %v862_v6 }
 0x324   : > { %v864_v7 = vpop.xlane.xlu0 %863 }
 0x325   : > { %v865_v9 = vsub.f32 %v858_v4, %v864_v7 }
 0x327   : > { %v866_v10 = vmul.f32 1.442695, %v865_v9 }
 0x329   : > { %1291 = vpow2.f32 %v866_v10 }
 0x333   : > { %v1292_v11 = vpop.eup %1291 }
 0x334   : > { %v868_v12 = vsel %vm861_vm4, %v1292_v11, 0.0 }
 0x335   : > { %869 = vadd.xlane.f32.xlu0 %v868_v12 }
 0x3c2   : > { %v870_v13 = vpop.xlane.xlu0 %869 }
 0x3c3   : > { %1293 = vlog2.f32 %v870_v13 }
 0x3cd   : > { %v1294_v15 = vpop.eup %1293 }
 0x3ce   : > { %v872_v16 = vmul.f32 0.6931472, %v1294_v15  ;;  %879 = sbr.rel (%p1020_p3) target bundleno = 981 (0x3d5), region = 76 }
 0x3d0   : > { %v873_v17 = vadd.f32 %v872_v16, %v864_v7 }
 0x3d2   : > { %v874_v18 = vsub.f32 %v858_v4, %v873_v17 }
 0x3d4   : > { %875 = vst [vmem:[%s1787_s17] sm:$0x1] %v874_v18 }
 0x3d5 PF: > { %s1021_s29 = sshll.u32 %s1629_s0, 4  ;;  %s894_s28 = sshll.u32 %s1787_s17, 4  ;;  %s895_s28 = int_to_ptr.vmem [resolvable:$true] %s894_s28 }
 0x3d6   : > { %s1845_s27 = scalar_lea.hbm %s1915_s9, %s1021_s29  ;;  %s882_s30 = scalar_lea.sflag [#allocation7], %s369_s14 }
 0x3d7   : > { %s1417_s18 = scalar_lea.vmem %s895_s28, 16  ;;  %p1948_p7 = scmp.ne.s32.totalorder %s1931_s12, 0 }
 0x3d8   : > { %p1418_p6 = scmp.ne.s32.totalorder %s895_s28, %s1417_s18  ;;  %s1539_s21 = smov [#allocation13]  }
 0x3d9   : > { %s1421_s13 = sshll.u32 %s1539_s21, 4  ;;  %s1422_s13 = int_to_ptr.vmem [resolvable:$false] %s1421_s13 }
 0x3da   : > { %p1419_p10 = pnand %p1418_p6, %p1948_p7  ;;  %s1423_s22 = scalar_lea.vmem %s1422_s13, 32 }
 0x3db   : > { %p1424_p1 = scmp.lt.s32.totalorder %s895_s28, %s1422_s13  ;;  %p1425_p5 = scmp.lt.s32.totalorder %s1423_s22, %s1417_s18 }
 0x3dc   : > { %p1420_p11 = pneg %p1419_p10 }
 0x3dd   : > { %p1426_p4 = por %p1425_p5, %p1424_p1 }
 0x3df   : > { %p1427_p8 = pnand %p1426_p4, %p1420_p11 }
 0x3e1   : > { %1430 = shalt.err (!%p1427_p8)
}
 0x3e2   : > { %s1431_s14 = scalar_lea.hbm %s1845_s27, 16  ;;  %s1435_s20 = scalar_lea.hbm %s1915_s9, 128 }
 0x3e3   : > { %p1432_p9 = scmp.ne.s32.totalorder %s1845_s27, %s1431_s14  ;;  %p1436_p2 = scmp.lt.u32.totalorder %s1845_s27, %s1915_s9 }
 0x3e4   : > { %p1437_p0 = scmp.lt.u32.totalorder %s1435_s20, %s1431_s14  ;;  %p1439_p6 = scmp.lt.u32.totalorder %s1431_s14, %s1845_s27 }
 0x3e5   : > { %p1433_p12 = pnand %p1432_p9, %p1948_p7 }
 0x3e6   : > { %p1438_p3 = por %p1437_p0, %p1436_p2 }
 0x3e7   : > { %p1434_p13 = pneg %p1433_p12 }
 0x3e8   : > { %p1440_p10 = por %p1439_p6, %p1438_p3 }
 0x3ea   : > { %p1441_p11 = pnand %p1440_p10, %p1434_p13 }
 0x3ec   : > { %1444 = shalt.err (!%p1441_p11)
}
 0x3ed   : > { %1200 = dma.vmem_to_hbm [thread:$0]  (%p1948_p7), %s895_s28, 16, %s1845_s27, %s882_s30  }
 0x3ee   : > { %s1540_s19 = smov [#allocation14]   ;;  %p1949_p5 = scmp.eq.s32.totalorder %s1629_s0, 7 }
 0x3ef   : > { %s905_s29 = sshll.u32 %s1540_s19, 4  ;;  %s906_s29 = int_to_ptr.vmem [resolvable:$true] %s905_s29 }
 0x3f0   : > { %s1445_s25 = scalar_lea.vmem %s906_s29, 16  ;;  %s1451_s3 = scalar_lea.vmem %s906_s29, 32 }
 0x3f1   : > { %p1446_p1 = scmp.ne.s32.totalorder %s906_s29, %s1445_s25  ;;  %p1452_p9 = scmp.lt.s32.totalorder %s906_s29, %s906_s29 }
 0x3f2   : > { %p1453_p12 = scmp.lt.s32.totalorder %s1451_s3, %s1445_s25 }
 0x3f3   : > { %p1447_p4 = pnand %p1446_p1, %p1949_p5 }
 0x3f4   : > { %p1454_p2 = por %p1453_p12, %p1452_p9 }
 0x3f5   : > { %p1448_p8 = pneg %p1447_p4 }
 0x3f7   : > { %p1455_p0 = pnand %p1454_p2, %p1448_p8 }
 0x3f9   : > { %1458 = shalt.err (!%p1455_p0)
}
 0x3fa   : > { %s1459_s12 = scalar_lea.hbm %s1916_s10, 16  ;;  %p1950_p13 = pmov %p1949_p5 }
 0x3fb   : > { %p1460_p7 = scmp.ne.s32.totalorder %s1916_s10, %s1459_s12  ;;  %p1465_p10 = scmp.lt.u32.totalorder %s1459_s12, %s1916_s10 }
 0x3fd   : > { %p1461_p3 = pnand %p1460_p7, %p1950_p13 }
 0x3ff   : > { %p1462_p6 = pneg %p1461_p3 }
 0x401   : > { %p1467_p11 = pnand %p1465_p10, %p1462_p6 }
 0x403   : > { %1470 = shalt.err (!%p1467_p11)
}
 0x404   : > { %p1951_p1 = pmov %p1949_p5 }
 0x406   : > { %1202 = dma.vmem_to_hbm [thread:$0]  (%p1951_p1), %s906_s29, 16, %s1916_s10, [#allocation15]  }
 0x407   : > { %p1952_p5 = pmov %p1951_p1 }
 0x408   : > { %p1953_p4 = pmov %p1951_p1 }
 0x409   : > { %1502 = dma.done.wait (%p1952_p5), [#allocation15], 16  }
 0x40a   : > { %1504 = vsyncadd (%p1953_p4), [#allocation15], 4294967280 }
 0x40b PF: > { %s1954_s17 = sld [smem:[#allocation25_spill]]  ;;  %p1233_p8 = scmp.ge.s32.totalorder %s1523_s26, 2 }
 0x40c   : > { %s921_s15 = sand.u32 1, %s1511_s23  }
 0x40d   : > { %s922_s20 = scalar_lea.sflag [#allocation7], %s921_s15 }
 0x411   : > { %p1955_p9 = scmp.ne.s32.totalorder %s1954_s17, 0 }
 0x413   : > { %p1220_p12 = pnand %p1233_p8, %p1955_p9 }
 0x415   : > { %1506 = dma.done.wait (!%p1220_p12), %s922_s20, 16  }
 0x416   : > { %1508 = vsyncadd (!%p1220_p12), %s922_s20, 4294967280  ;;  %s1956_s26 = sld [smem:[#allocation23_spill]]  ;;  %s1957_s16 = sld [smem:[#allocation22_spill]] }
 0x417   : > { %s1958_s25 = sld [smem:[#allocation24_spill]]  ;;  %s1959_s23 = smov %s1515_s24 }
 0x41c   : > { %p29_p2 = scmp.ge.s32.totalorder %s1956_s26, 10   ;;  %s1960_s24 = smov %s1957_s16 }
 0x41e   :  { %31 = sbr.rel (!%p29_p2) target bundleno = 19 (0x13), region = 118 }
 0x425   :  { %926 = vsyncpa [#allocation6], 1 }
 0x426   :  { %928 = vsyncpa [#allocation6 + $0x1], 1 }
 0x427   :  { %929 = vsyncpa [#allocation9], 1 }
 0x428   :  { %930 = vsyncpa [#allocation12], 1 }
 0x429   :  { %931 = vsyncpa [#allocation7], 1 }
 0x42a   :  { %933 = vsyncpa [#allocation7 + $0x1], 1 }
 0x42b   :  { %934 = vsyncpa [#allocation15], 1 }

</bundles_post_ra>
